<compile_context>
chip_gen: v7x
topology: tpu7x:2x2x1
jax: 0.10.0
libtpu: 0.0.40
codegen_flags: <defaults>
</compile_context>

<pallas_src>
import functools
import math

import jax
import jax.numpy as jnp
from jax.experimental import pallas as pl
from jax.experimental.pallas import tpu as pltpu


_TARGET_CHUNK_BYTES = 4 * 1024 * 1024  # ~4 MiB per DMA: amortizes per-step
                                       # overhead, still yields >= 2 chunks on
                                       # modest inputs (v7x dual-TC).


def asr_decoder_forward(x: jnp.ndarray) -> jnp.ndarray:
    """ASRDecoder.forward(x) == x: identity — zero data movement, no kernel."""
    return x


def _dma_copy_kernel(x_hbm, o_hbm, sem, *, axis, chunk, extent):
    """One grid step: direct HBM->HBM DMA of one static-size chunk on `axis`."""
    i = pl.program_id(0)
    # Clamp the last (possibly partial) chunk so the DMA size stays static;
    # the overlap rewrites identical bytes, which is harmless for a copy.
    start = jnp.minimum(i * chunk, extent - chunk)
    if axis == 0:
        src = x_hbm.at[pl.ds(start, chunk)]
        dst = o_hbm.at[pl.ds(start, chunk)]
    else:  # axis == 1 (sublane axis of the 3-D view)
        src = x_hbm.at[:, pl.ds(start, chunk), :]
        dst = o_hbm.at[:, pl.ds(start, chunk), :]
    cp = pltpu.make_async_copy(src, dst, sem)
    cp.start()
    cp.wait()


def _layout_preserving_3d_view(x):
    """(L, A, B) view that only collapses/adds leading dims (free bitcast)."""
    if x.ndim == 0:
        return x.reshape(1, 1, 1)
    if x.ndim == 1:
        return x.reshape(1, 1, x.shape[0])
    lead = math.prod(x.shape[:-2]) if x.ndim > 2 else 1
    return x.reshape(lead, x.shape[-2], x.shape[-1])


@jax.jit
def asr_decoder_forward_materialized(x: jnp.ndarray) -> jnp.ndarray:
    """Identity forward materialized into a fresh buffer via HBM->HBM DMA."""
    total = math.prod(x.shape)
    if total == 0:
        return x  # empty tensor: nothing to copy

    itemsize = jnp.dtype(x.dtype).itemsize
    xv = _layout_preserving_3d_view(x)
    L, A, B = xv.shape

    # Chunk over the leading axis when it has extent (chunks are whole
    # (8,128) tiles by construction), else over the sublane axis (8-aligned).
    axis = 0 if L > 1 else 1
    extent = xv.shape[axis]

    bytes_per_unit = max(1, (total * itemsize) // extent)
    chunk = max(1, _TARGET_CHUNK_BYTES // bytes_per_unit)
    if axis == 1 and extent >= 8:
        chunk = max(8, (chunk // 8) * 8)
    chunk = min(chunk, extent)

    # Ensure >= 2 grid steps whenever possible so both v7x TensorCores issue
    # DMAs under dimension_semantics=("parallel",).
    if chunk == extent and extent >= 2:
        half = (extent + 1) // 2
        if axis == 1 and extent >= 16:
            half = ((half + 7) // 8) * 8
        chunk = min(half, extent - 1) if half >= extent else half

    grid = (pl.cdiv(extent, chunk),)

    out = pl.pallas_call(
        functools.partial(_dma_copy_kernel, axis=axis, chunk=chunk,
                          extent=extent),
        out_shape=jax.ShapeDtypeStruct(xv.shape, xv.dtype),
        grid_spec=pltpu.PrefetchScalarGridSpec(
            num_scalar_prefetch=0,
            grid=grid,
            in_specs=[pl.BlockSpec(memory_space=pl.ANY)],   # raw HBM ref
            out_specs=pl.BlockSpec(memory_space=pl.ANY),    # kernel DMAs into it
            scratch_shapes=[pltpu.SemaphoreType.DMA],
        ),
        compiler_params=pltpu.CompilerParams(
            dimension_semantics=("parallel",),  # v7x: both TCs drive DMA
        ),
        cost_estimate=pl.CostEstimate(
            flops=0, transcendentals=0,
            bytes_accessed=2 * total * itemsize),
    )(xv)
    return out.reshape(x.shape)


if __name__ == "__main__":
    key = jax.random.PRNGKey(0)
    # Small NCHW-style input consistent with an audio/decoder feature map.
    x = jax.random.normal(key, (2, 4, 16, 16), dtype=jnp.float32)

    # Primary (recommended) path: pure identity, zero data movement.
    y = asr_decoder_forward(x)

    # Materialized-copy path: direct HBM->HBM DMA Pallas kernel.
    y_copy = asr_decoder_forward_materialized(x)
    jax.block_until_ready(y_copy)

    # Verify identity semantics exactly.
    assert y is x
    assert y_copy.shape == x.shape
    assert y_copy.dtype == x.dtype
    assert bool(jnp.array_equal(y_copy, x))

    print("KERNEL_OK")
</pallas_src>

<mosaic_0001>
module attributes {stable_mosaic.version = 11 : i64} {
  func.func @_dma_copy_kernel(%arg0: i32, %arg1: memref<8x16x16xf32, #tpu.memory_space<any>>, %arg2: memref<8x16x16xf32, #tpu.memory_space<any>>, %arg3: memref<!tpu.dma_semaphore, #tpu.memory_space<semaphore_mem>>) attributes {dimension_semantics = [#tpu.dimension_semantics<parallel>], iteration_bounds = array<i64: 2>, scalar_prefetch = 0 : i64, scratch_operands = 1 : i64, tpu.core_type = #tpu.core_type<tc>, window_params = [{}, {}]} {
    %c4_i32 = arith.constant 4 : i32
    %0 = arith.muli %arg0, %c4_i32 : i32
    %c4_i32_0 = arith.constant 4 : i32
    %1 = arith.minsi %0, %c4_i32_0 : i32
    %c0_i32 = arith.constant 0 : i32
    %c0_i32_1 = arith.constant 0 : i32
    %2 = tpu.memref_slice %arg1[%1, %c0_i32, %c0_i32_1] : memref<8x16x16xf32, #tpu.memory_space<any>> -> memref<4x16x16xf32, #tpu.memory_space<any>>
    %c0_i32_2 = arith.constant 0 : i32
    %c0_i32_3 = arith.constant 0 : i32
    %3 = tpu.memref_slice %arg2[%1, %c0_i32_2, %c0_i32_3] : memref<8x16x16xf32, #tpu.memory_space<any>> -> memref<4x16x16xf32, #tpu.memory_space<any>>
    tpu.enqueue_dma source(%2 : memref<4x16x16xf32, #tpu.memory_space<any>>) target(%3 : memref<4x16x16xf32, #tpu.memory_space<any>>) target_semaphore(%arg3 : memref<!tpu.dma_semaphore, #tpu.memory_space<semaphore_mem>>)
    %c0_i32_4 = arith.constant 0 : i32
    %c0_i32_5 = arith.constant 0 : i32
    %4 = tpu.memref_slice %arg1[%1, %c0_i32_4, %c0_i32_5] : memref<8x16x16xf32, #tpu.memory_space<any>> -> memref<4x16x16xf32, #tpu.memory_space<any>>
    %c0_i32_6 = arith.constant 0 : i32
    %c0_i32_7 = arith.constant 0 : i32
    %5 = tpu.memref_slice %arg2[%1, %c0_i32_6, %c0_i32_7] : memref<8x16x16xf32, #tpu.memory_space<any>> -> memref<4x16x16xf32, #tpu.memory_space<any>>
    tpu.wait_dma2 semaphore(%arg3 : memref<!tpu.dma_semaphore, #tpu.memory_space<semaphore_mem>>) src(%4 : memref<4x16x16xf32, #tpu.memory_space<any>>) dst(%5 : memref<4x16x16xf32, #tpu.memory_space<any>>)
    return
  }
}

</mosaic_0001>

<bundles_post_ra>
// kernel: asr_decoder_forward_materialized.1
= control target key start
LH: loop header
LB: loop body
LE: loop exit
PB: predicated region body
PF: predicated region fallthrough
CT: control target
= control target key end

     0   :  { %s77_s6 = smov 0   ;;  %s100_s0 = inlined_call_operand.hbm [shape: f32[8,16,16], index: 0, kind: input, shape index: {}]   ;;  %s101_s1 = inlined_call_operand.hbm [shape: f32[8,16,16], index: 1, kind: output, shape index: {}]  }
   0x1 LB: > { %s53_s7 = sshll.u32 %s79_s6, 2  ;;  %s81_s15 = smov [#allocation2]   ;;  %s79_s6 = sphi %s77_s6, %s11_s6  }
   0x2   : > { %p14_p0 = scmp.lt.s32.totalorder %s53_s7, 4  ;;  %s82_s16 = smov [#allocation3]  }
   0x3   : > { %s83_s17 = smov 0  }
   0x4   : > { %s103_s7 = smov (!%p14_p0, %s53_s7), 4 }
   0x5   : > { %s58_s8 = sshll.u32 %s103_s7, 8 }
   0x6   : > { %s18_s11 = scalar_lea.hbm %s100_s0, %s58_s8  ;;  %s20_s14 = scalar_lea.hbm %s101_s1, %s58_s8 }
   0x7   : > { %33 = dma.general %s18_s11, 1024, %s20_s14, %s81_s15, %s82_s16, [#allocation4], %s83_s17, 0  }
   0x8   : > { %75 = dma.done.wait [#allocation2], 1024 }
   0x9   : > { %76 = vsyncadd [#allocation2], 4294966272  ;;  %s11_s6 = sadd.s32 1, %s79_s6  }
   0xa   : > { %p8_p1 = scmp.ge.s32.totalorder %s11_s6, 2  }
   0xc   :  { %10 = sbr.rel (!%p8_p1) target bundleno = 1 (0x1), region = 21 }
  0x13   :  { %38 = vsyncmov [#allocation2] }
  0x16   :  { %s39_s18 = vpop.sfrf %38 }
  0x17   :  { %p57_p2 = scmp.ne.s32.totalorder %s39_s18, 0 }
  0x19   :  { %43 = shalt.err (%p57_p2)  }

</bundles_post_ra>
